<compile_context>
chip_gen: v6e
topology: v6e:2x2x1
jax: 0.10.0
libtpu: 0.0.40
codegen_flags: <defaults>
</compile_context>

<pallas_src>
import jax
import jax.numpy as jnp
from jax.experimental import pallas as pl
from jax.experimental.pallas import tpu as pltpu


def _focus_conv_bn_silu_kernel(x_ref, w_ref, b_ref, o_ref):
    # x_ref: (th, Wo, K)  bf16 -- channel-stacked im2col rows for this tile (K = 9*Cin)
    # w_ref: (K, Cp)      bf16 -- conv weights with BN scale folded, Cout padded to Cp
    # b_ref: (1, Cp)      f32  -- folded conv bias + BN shift
    # o_ref: (th, Wo, Cp) bf16 -- one tile of output rows (NHWC, lane-dense Cp)
    th, wo, k = x_ref.shape
    cp = o_ref.shape[-1]

    lhs = x_ref[...].reshape(th * wo, k)                       # bf16, minor dim unchanged
    acc = jnp.dot(lhs, w_ref[...],
                  preferred_element_type=jnp.float32)          # single MXU GEMM, f32 acc
    y = acc + b_ref[...]                                       # folded BN affine (f32)
    y = y * jax.nn.sigmoid(y)                                  # SiLU in f32 (EUP)
    o_ref[...] = y.reshape(th, wo, cp).astype(o_ref.dtype)     # lane-dense bf16 store


def _pick_row_tile(ho, wo, k, cp, vmem_budget_bytes):
    """Largest divisor of `ho` whose tile fits the VMEM budget (<= 4096 GEMM rows)."""
    # Per output pixel: double-buffered bf16 input + output tiles, plus the f32
    # accumulator / epilogue intermediates the single dot keeps live.
    per_pixel = 2 * (k * 2) + 2 * (cp * 2) + 2 * (cp * 4)
    max_pixels = max(1, vmem_budget_bytes // per_pixel)
    target = min(4096, max_pixels)
    th = 1
    for cand in range(1, ho + 1):
        if ho % cand == 0 and cand * wo <= target:
            th = cand
    return th


def focus_block_forward(x_nchw, conv_w, conv_b, bn_gamma, bn_beta,
                        bn_mean, bn_var, *, eps=1e-5):
    """FocusBlock forward. x_nchw: (N, C, H, W) f32. Returns (N, Cout, H//2, W//2) f32."""
    N, C, H, W = x_nchw.shape
    assert H % 2 == 0 and W % 2 == 0
    Ho, Wo = H // 2, W // 2
    Cin = 4 * C
    K = 9 * Cin
    Cout = conv_w.shape[0]
    Cp = ((Cout + 127) // 128) * 128          # lane-dense output channel count

    # ---- Focus space-to-depth fused into one reshape/transpose (NHWC, bf16) ----
    # PyTorch concat order [tl, tr, bl, br] = [(h0,w0),(h1,w0),(h0,w1),(h1,w1)]
    # => channel = wp*2*C + hp*C + c, i.e. axes (wp, hp, c) flattened, wp slowest.
    xr = x_nchw.reshape(N, C, Ho, 2, Wo, 2)                       # (n, c, ho, hp, wo, wp)
    xf = jnp.transpose(xr, (0, 2, 4, 5, 3, 1)).reshape(N, Ho, Wo, Cin)
    xf = xf.astype(jnp.bfloat16)

    # ---- Channel-stacked im2col slab: 9 (dh, dw) taps along the last dim ----
    xp = jnp.pad(xf, ((0, 0), (1, 1), (1, 1), (0, 0)))            # (N, Ho+2, Wo+2, Cin)
    x_col = jnp.concatenate(
        [xp[:, dh:dh + Ho, dw:dw + Wo, :] for dh in range(3) for dw in range(3)],
        axis=-1)                                                  # (N, Ho, Wo, 9*Cin) bf16

    # ---- Fold conv bias + eval-mode BN into the weights / a per-channel bias ----
    scale = bn_gamma / jnp.sqrt(bn_var + eps)                               # (Cout,)
    w_flat = jnp.transpose(conv_w, (2, 3, 1, 0)).reshape(K, Cout)           # k = (dh*3+dw)*Cin + cin
    w_folded = (w_flat * scale[None, :]).astype(jnp.bfloat16)               # bf16 MXU operand
    bias = (bn_beta + scale * (conv_b - bn_mean)).astype(jnp.float32)
    if Cp != Cout:                                    # zero-pad to lane-dense Cp
        w_folded = jnp.pad(w_folded, ((0, 0), (0, Cp - Cout)))
        bias = jnp.pad(bias, ((0, Cp - Cout),))
    bias = bias.reshape(1, Cp)

    # ---- Tiling: row-blocked, VMEM-budgeted (safe for v7x's 64 MiB VMEM) ----
    vmem_budget = 40 * 1024 * 1024
    th = _pick_row_tile(Ho, Wo, K, Cp, vmem_budget)
    grid = (N, Ho // th)

    in_tile = th * Wo * K * 2
    out_tile = th * Wo * Cp * 2
    acc_tile = th * Wo * Cp * 4
    vmem_limit = int(1.5 * (2 * in_tile + 2 * out_tile + 2 * acc_tile
                            + K * Cp * 2 + Cp * 4))
    vmem_limit = min(max(vmem_limit, 8 * 1024 * 1024), 56 * 1024 * 1024)

    M = N * Ho * Wo
    cost = pl.CostEstimate(
        flops=2 * M * K * Cp,
        transcendentals=M * Cp,
        bytes_accessed=(x_col.size * 2 + w_folded.size * 2
                        + bias.size * 4 + M * Cp * 2),
    )

    out = pl.pallas_call(
        _focus_conv_bn_silu_kernel,
        out_shape=jax.ShapeDtypeStruct((N, Ho, Wo, Cp), jnp.bfloat16),
        grid_spec=pltpu.PrefetchScalarGridSpec(
            num_scalar_prefetch=0,
            grid=grid,
            in_specs=[
                pl.BlockSpec((None, th, Wo, K), lambda n, r: (n, r, 0, 0)),
                pl.BlockSpec((K, Cp), lambda n, r: (0, 0)),
                pl.BlockSpec((1, Cp), lambda n, r: (0, 0)),
            ],
            out_specs=pl.BlockSpec((None, th, Wo, Cp), lambda n, r: (n, r, 0, 0)),
        ),
        compiler_params=pltpu.CompilerParams(
            # Disjoint output tiles on both axes -> shard across TCs (v7x).
            dimension_semantics=("parallel", "parallel"),
            vmem_limit_bytes=vmem_limit,
        ),
        cost_estimate=cost,
    )(x_col, w_folded, bias)

    out = out[..., :Cout].astype(jnp.float32)                    # drop lane padding
    return jnp.transpose(out, (0, 3, 1, 2))                      # NHWC -> NCHW


def _reference_forward(x_nchw, conv_w, conv_b, bn_gamma, bn_beta, bn_mean, bn_var, eps=1e-5):
    """Pure-JAX reference (lax conv) for a correctness sanity check."""
    top_left = x_nchw[:, :, 0::2, 0::2]
    top_right = x_nchw[:, :, 1::2, 0::2]
    bot_left = x_nchw[:, :, 0::2, 1::2]
    bot_right = x_nchw[:, :, 1::2, 1::2]
    xf = jnp.concatenate([top_left, top_right, bot_left, bot_right], axis=1)
    z = jax.lax.conv_general_dilated(
        xf, conv_w, window_strides=(1, 1), padding=((1, 1), (1, 1)),
        dimension_numbers=('NCHW', 'OIHW', 'NCHW'))
    z = z + conv_b[None, :, None, None]
    z = (z - bn_mean[None, :, None, None]) / jnp.sqrt(bn_var[None, :, None, None] + eps)
    z = z * bn_gamma[None, :, None, None] + bn_beta[None, :, None, None]
    return z * jax.nn.sigmoid(z)


if __name__ == "__main__":
    in_channels = 4
    out_channels = 64          # FocusBlock default
    N, H, W = 2, 16, 16
    Cin = 4 * in_channels      # channels after Focus slicing

    key = jax.random.PRNGKey(0)
    kx, kw, kb, kg, kbeta, km, kv = jax.random.split(key, 7)

    x = jax.random.normal(kx, (N, in_channels, H, W), dtype=jnp.float32)

    # Deterministic synthetic parameters (shapes from the module __init__).
    conv_w = 0.05 * jax.random.normal(kw, (out_channels, Cin, 3, 3), dtype=jnp.float32)
    conv_b = 0.1 * jax.random.normal(kb, (out_channels,), dtype=jnp.float32)
    bn_gamma = 1.0 + 0.1 * jax.random.normal(kg, (out_channels,), dtype=jnp.float32)
    bn_beta = 0.1 * jax.random.normal(kbeta, (out_channels,), dtype=jnp.float32)
    bn_mean = 0.05 * jax.random.normal(km, (out_channels,), dtype=jnp.float32)
    bn_var = 1.0 + 0.1 * jax.nn.softplus(jax.random.normal(kv, (out_channels,), dtype=jnp.float32))

    fwd = jax.jit(focus_block_forward)
    out = jax.block_until_ready(
        fwd(x, conv_w, conv_b, bn_gamma, bn_beta, bn_mean, bn_var))
    assert out.shape == (N, out_channels, H // 2, W // 2), out.shape

    ref = jax.block_until_ready(
        _reference_forward(x, conv_w, conv_b, bn_gamma, bn_beta, bn_mean, bn_var))
    max_err = float(jnp.max(jnp.abs(out - ref)))
    # Activations / weights / output stream in bf16 -> small quantization tolerance.
    assert jnp.allclose(out, ref, atol=2e-2, rtol=2e-2), max_err

    print("KERNEL_OK")
</pallas_src>

<mosaic_0001>
module attributes {stable_mosaic.version = 11 : i64} {
  func.func @_focus_conv_bn_silu_kernel(%arg0: i32, %arg1: i32, %arg2: memref<1x8x8x144xbf16, #tpu.memory_space<vmem>>, %arg3: memref<144x128xbf16, #tpu.memory_space<vmem>>, %arg4: memref<1x128xf32, #tpu.memory_space<vmem>>, %arg5: memref<1x8x8x128xbf16, #tpu.memory_space<vmem>>) attributes {dimension_semantics = [#tpu.dimension_semantics<parallel>, #tpu.dimension_semantics<parallel>], iteration_bounds = array<i64: 2, 1>, scalar_prefetch = 0 : i64, scratch_operands = 0 : i64, tpu.core_type = #tpu.core_type<tc>, window_params = [{transform_indices = @transform_0, window_bounds = array<i64: 1, 8, 8, 144>}, {pipeline_mode = #tpu.pipeline_mode<synchronous>, transform_indices = @transform_1, window_bounds = array<i64: 144, 128>}, {pipeline_mode = #tpu.pipeline_mode<synchronous>, transform_indices = @transform_2, window_bounds = array<i64: 1, 128>}, {transform_indices = @transform_3, window_bounds = array<i64: 1, 8, 8, 128>}]} {
    %c0 = arith.constant 0 : index
    %c0_0 = arith.constant 0 : index
    %c0_1 = arith.constant 0 : index
    %c0_2 = arith.constant 0 : index
    %0 = vector.load %arg2[%c0, %c0_0, %c0_1, %c0_2] : memref<1x8x8x144xbf16, #tpu.memory_space<vmem>>, vector<1x8x8x144xbf16>
    %1 = vector.shape_cast %0 : vector<1x8x8x144xbf16> to vector<8x8x144xbf16>
    %2 = vector.shape_cast %1 : vector<8x8x144xbf16> to vector<64x144xbf16>
    %c0_3 = arith.constant 0 : index
    %c0_4 = arith.constant 0 : index
    %3 = vector.load %arg3[%c0_3, %c0_4] : memref<144x128xbf16, #tpu.memory_space<vmem>>, vector<144x128xbf16>
    %cst = arith.constant dense<0.000000e+00> : vector<64x128xf32>
    %4 = tpu.matmul %2, %3, %cst {dimension_numbers = #tpu.dot_dimension_numbers<[1], [0], [0], [1], [0, 0, 1, 1], [], []>} : vector<64x144xbf16>, vector<144x128xbf16>, vector<64x128xf32> -> vector<64x128xf32>
    %c0_5 = arith.constant 0 : index
    %c0_6 = arith.constant 0 : index
    %5 = vector.load %arg4[%c0_5, %c0_6] : memref<1x128xf32, #tpu.memory_space<vmem>>, vector<1x128xf32>
    %6 = vector.broadcast %5 : vector<1x128xf32> to vector<64x128xf32>
    %7 = arith.addf %4, %6 : vector<64x128xf32>
    %8 = arith.negf %7 : vector<64x128xf32>
    %9 = math.exp %8 : vector<64x128xf32>
    %cst_7 = arith.constant 1.000000e+00 : f32
    %10 = vector.broadcast %cst_7 : f32 to vector<64x128xf32>
    %11 = arith.addf %10, %9 : vector<64x128xf32>
    %12 = arith.divf %10, %11 : vector<64x128xf32>
    %13 = arith.mulf %7, %12 : vector<64x128xf32>
    %14 = vector.shape_cast %13 : vector<64x128xf32> to vector<8x8x128xf32>
    %15 = arith.truncf %14 : vector<8x8x128xf32> to vector<8x8x128xbf16>
    %c0_8 = arith.constant 0 : index
    %c0_9 = arith.constant 0 : index
    %c0_10 = arith.constant 0 : index
    %c0_11 = arith.constant 0 : index
    %16 = vector.load %arg5[%c0_8, %c0_9, %c0_10, %c0_11] : memref<1x8x8x128xbf16, #tpu.memory_space<vmem>>, vector<1x8x8x128xbf16>
    %17 = vector.shape_cast %16 : vector<1x8x8x128xbf16> to vector<8x8x128xbf16>
    %18 = vector.shape_cast %15 : vector<8x8x128xbf16> to vector<1x8x8x128xbf16>
    tpu.vector_store %arg5[%c0_8, %c0_9, %c0_10, %c0_11], %18 {strides = array<i32>} : memref<1x8x8x128xbf16, #tpu.memory_space<vmem>>, vector<1x8x8x128xbf16>,
    return
  }
  func.func @transform_0(%arg0: i32, %arg1: i32) -> (i32, i32, i32, i32) {
    %c0_i32 = arith.constant 0 : i32
    %c0_i32_0 = arith.constant 0 : i32
    %c0_i32_1 = arith.constant 0 : i32
    return %arg0, %arg1, %c0_i32, %c0_i32_0 : i32, i32, i32, i32
  }
  func.func @transform_1(%arg0: i32, %arg1: i32) -> (i32, i32) {
    %c0_i32 = arith.constant 0 : i32
    %c0_i32_0 = arith.constant 0 : i32
    %c0_i32_1 = arith.constant 0 : i32
    return %c0_i32, %c0_i32_0 : i32, i32
  }
  func.func @transform_2(%arg0: i32, %arg1: i32) -> (i32, i32) {
    %c0_i32 = arith.constant 0 : i32
    %c0_i32_0 = arith.constant 0 : i32
    %c0_i32_1 = arith.constant 0 : i32
    return %c0_i32, %c0_i32_0 : i32, i32
  }
  func.func @transform_3(%arg0: i32, %arg1: i32) -> (i32, i32, i32, i32) {
    %c0_i32 = arith.constant 0 : i32
    %c0_i32_0 = arith.constant 0 : i32
    %c0_i32_1 = arith.constant 0 : i32
    return %arg0, %arg1, %c0_i32, %c0_i32_0 : i32, i32, i32, i32
  }
}

</mosaic_0001>

<bundles_post_ra>
// kernel: focus_block_forward.1
= control target key start
LH: loop header
LB: loop body
LE: loop exit
PB: predicated region body
PF: predicated region fallthrough
CT: control target
= control target key end

     0   :  { %s784_s12 = smov 0   ;;  %s786_s13 = smov 0   ;;  %s873_s0 = inlined_call_operand.vmem [shape: bf16[2,8,8,144], index: 0, kind: input, shape index: {}]   ;;  %s874_s1 = inlined_call_operand.vmem [shape: bf16[144,128], index: 1, kind: input, shape index: {}]   ;;  %s875_s2 = inlined_call_operand.vmem [shape: f32[1,128], index: 2, kind: input, shape index: {}]   ;;  %s876_s3 = inlined_call_operand.vmem [shape: bf16[2,8,8,128], index: 3, kind: output, shape index: {}]  }
   0x1   :  { %s788_s14 = smov 0  }
   0x2 LB: > { %s25_s15 = sadd.s32 1, %s757_s13  ;;  %p581_p0 = scmp.ge.s32.totalorder %s761_s14, 1  ;;  %s761_s14 = sphi %s788_s14, %s13_s14   ;;  %s757_s13 = sphi %s786_s13, %s878_s13   ;;  %s753_s12 = sphi %s784_s12, %s877_s12  }
   0x3   : > { %p27_p1 = scmp.ge.s32.totalorder %s25_s15, 2  ;;  %p159_p2 = scmp.lt.s32.totalorder %s761_s14, 3 }
   0x5   : > { %s880_s15 = smov (%p27_p1, %s25_s15), 0  ;;  %p160_p3 = pnand %p581_p0, %p159_p2 }
   0x6   : > { %p193_p4 = scmp.lt.s32.totalorder (!%p160_p3), %s753_s12, 1 }
   0x7   : > { %163 = sbr.rel (%p160_p3) target bundleno = 294 (0x126), region = 32 }
   0xc   : > { %v686_v0 = vld [vmem:[%s874_s1 + $0x38] sm:$0xff]   ;;  %v763_v1 = vmov 0   ;;  %v687_v2 = vld [vmem:[%s874_s1 + $0x30] sm:$0xff]   ;;  %s882_s12 = smov (!%p193_p4, %s753_s12), 1  ;;  %v688_v3 = vld [vmem:[%s874_s1 + $0x28] sm:$0xff]   ;;  %vm337_vm0 = vcmask 130048  }
   0xd   : > { %350 = vmatprep.subr.bf16.mxu0 %v763_v1  ;;  %643 = vmatprep.subr.bf16.mxu1 %v763_v1  ;;  %s618_s20 = sshll.u32 %s882_s12, 6  ;;  %v689_v4 = vld [vmem:[%s874_s1 + $0x20] sm:$0xff]   ;;  %v690_v7 = vld [vmem:[%s874_s1 + $0x18] sm:$0xff]   ;;  %v691_v8 = vld [vmem:[%s874_s1 + $0x10] sm:$0xff]   ;;  %s619_s17 = sshll.u32 %s882_s12, 5 }
   0xe   : > { %351 = vmatpush1.bf16.msra.mxu0 %v686_v0  ;;  %652 = vmatpush1.bf16.msra.mxu1 %v686_v0  ;;  %s817_s25 = scalar_lea.vmem %s873_s0, %s618_s20  ;;  %v692_v9 = vld [vmem:[%s874_s1 + $0x8] sm:$0xff]   ;;  %v693_v10 = vld [vmem:[%s874_s1] sm:$0xff]   ;;  %s211_s20 = scalar_lea.vmem %s876_s3, %s619_s17 }
   0xf   : > { %352 = vmatprep.subr.bf16.mxu0 %v763_v1  ;;  %644 = vmatprep.subr.bf16.mxu1 %v763_v1  ;;  %v697_v5 = vld [vmem:[%s817_s25 + $0x4] ss:$8 sps:$4 sm:$0xff]   ;;  %v695_v12 = vld [vmem:[%s817_s25] ss:$8 sps:$4 sm:$0xff]   ;;  %v701_v14 = vld [vmem:[%s817_s25 + $0x14] ss:$8 sps:$4 sm:$0xff]  }
  0x10   : > { %v700_v6 = vld [vmem:[%s817_s25 + $0x24] ss:$8 sps:$4 sm:$0xff]   ;;  %604 = vmatprep.mubr.msk.bf16.mxu0 %vm337_vm0, %v697_v5  ;;  %v698_v13 = vld [vmem:[%s817_s25 + $0x20] ss:$8 sps:$4 sm:$0xff]   ;;  %v703_v15 = vld [vmem:[%s817_s25 + $0x34] ss:$8 sps:$4 sm:$0xff]  }
  0x11   : > { %606 = vmatprep.mubr.msk.bf16.mxu1 %vm337_vm0, %v700_v6  ;;  %v694_v11 = vld [vmem:[%s874_s1 + $0x40] sm:$0xff]   ;;  %v705_v16 = vld [vmem:[%s817_s25 + $0x10] ss:$8 sps:$4 sm:$0xff]  }
  0x12   : > { %353 = vmatpush1.bf16.msra.mxu0 %v687_v2  ;;  %653 = vmatpush1.bf16.msra.mxu1 %v687_v2  ;;  %v706_v17 = vld [vmem:[%s817_s25 + $0x30] ss:$8 sps:$4 sm:$0xff]   ;;  %v586_v18 = vld [vmem:[%s875_s2] ss:$0 sm:$0xff] }
  0x13   : > { %354 = vmatprep.subr.bf16.mxu0 %v763_v1  ;;  %645 = vmatprep.subr.bf16.mxu1 %v763_v1 }
  0x16   : > { %355 = vmatpush1.bf16.msra.mxu0 %v688_v3  ;;  %654 = vmatpush1.bf16.msra.mxu1 %v688_v3 }
  0x17   : > { %356 = vmatprep.subr.bf16.mxu0 %v763_v1  ;;  %646 = vmatprep.subr.bf16.mxu1 %v763_v1 }
  0x1a   : > { %357 = vmatpush1.bf16.msra.mxu0 %v689_v4  ;;  %655 = vmatpush1.bf16.msra.mxu1 %v689_v4 }
  0x1b   : > { %358 = vmatprep.subr.bf16.mxu0 %v763_v1  ;;  %647 = vmatprep.subr.bf16.mxu1 %v763_v1 }
  0x1e   : > { %359 = vmatpush1.bf16.msra.mxu0 %v690_v7  ;;  %656 = vmatpush1.bf16.msra.mxu1 %v690_v7 }
  0x1f   : > { %360 = vmatprep.subr.bf16.mxu0 %v763_v1  ;;  %648 = vmatprep.subr.bf16.mxu1 %v763_v1 }
  0x22   : > { %361 = vmatpush1.bf16.msra.mxu0 %v691_v8  ;;  %657 = vmatpush1.bf16.msra.mxu1 %v691_v8 }
  0x23   : > { %362 = vmatprep.subr.bf16.mxu0 %v763_v1  ;;  %649 = vmatprep.subr.bf16.mxu1 %v763_v1 }
  0x26   : > { %363 = vmatpush1.bf16.msra.mxu0 %v692_v9  ;;  %658 = vmatpush1.bf16.msra.mxu1 %v692_v9 }
  0x27   : > { %364 = vmatprep.subr.bf16.mxu0 %v763_v1  ;;  %650 = vmatprep.subr.bf16.mxu1 %v763_v1 }
  0x2a   : > { %365 = vmatpush1.bf16.msra.mxu0 %v693_v10  ;;  %659 = vmatpush1.bf16.msra.mxu1 %v693_v10 }
  0x2b   : > { %380 = vmatprep.subr.bf16.mxu0 %v763_v1  ;;  %651 = vmatprep.subr.bf16.mxu1 %v763_v1 }
  0x2e   : > { %381 = vmatpush2.bf16.msra.mxu0 %v694_v11  ;;  %660 = vmatpush2.bf16.msra.mxu1 %v694_v11 }
  0x31   : > { %383 = vmatmul.mubr.bf16.vlgmr.msra.gmra.mxu0 %v695_v12  ;;  %399 = vmatmul.mubr.bf16.vlgmr.msra.gmra.mxu1 %v698_v13 }
  0x32   : > { %605 = vmatprep.mubr.msk.bf16.mxu0 %vm337_vm0, %v701_v14  ;;  %607 = vmatprep.mubr.msk.bf16.mxu1 %vm337_vm0, %v703_v15 }
  0x39   : > { %391 = vmatmul.mubr.bf16.gmra.mxu0 %v705_v16  ;;  %407 = vmatmul.mubr.bf16.gmra.mxu1 %v706_v17 }
  0xf1   : > { %v384_v19 = vpop.f32.mrf.mxu0  ;;  %v400_v20 = vpop.f32.mrf.mxu1 }
  0xf2   : > { %v852_v21 = vadd.f32 %v586_v18, %v384_v19  ;;  %v854_v22 = vadd.f32 %v586_v18, %v400_v20 }
  0xf3   : > { %v386_v23 = vpop.f32.mrf.mxu0  ;;  %v402_v24 = vpop.f32.mrf.mxu1 }
  0xf4   : > { %v608_v25 = vmul.f32 -1.442695, %v852_v21  ;;  %v612_v26 = vmul.f32 -1.442695, %v854_v22 }
  0xf5   : > { %v387_v27 = vpop.f32.mrf.mxu0  ;;  %v403_v28 = vpop.f32.mrf.mxu1 }
  0xf6   : > { %707 = vpow2.f32 %v608_v25  ;;  %v388_v29 = vadd.f32 %v586_v18, %v387_v27  ;;  %v404_v30 = vadd.f32 %v586_v18, %v403_v28 }
  0xf7   : > { %709 = vpow2.f32 %v612_v26  ;;  %v389_v31 = vpop.f32.mrf.mxu0  ;;  %v405_v32 = vpop.f32.mrf.mxu1 }
  0xf8   : > { %v609_v33 = vmul.f32 -1.442695, %v388_v29  ;;  %v613_v34 = vmul.f32 -1.442695, %v404_v30 }
  0xf9   : > { %v392_v35 = vpop.f32.mrf.mxu0  ;;  %v408_v36 = vpop.f32.mrf.mxu1 }
  0xfa   : > { %711 = vpow2.f32 %v609_v33  ;;  %v393_v37 = vadd.f32 %v586_v18, %v392_v35  ;;  %v409_v38 = vadd.f32 %v586_v18, %v408_v36 }
  0xfb   : > { %713 = vpow2.f32 %v613_v34  ;;  %v394_v39 = vpop.f32.mrf.mxu0  ;;  %v410_v40 = vpop.f32.mrf.mxu1 }
  0xfc   : > { %v610_v41 = vmul.f32 -1.442695, %v393_v37  ;;  %v614_v42 = vmul.f32 -1.442695, %v409_v38 }
  0xfd   : > { %v395_v43 = vpop.f32.mrf.mxu0  ;;  %v411_v44 = vpop.f32.mrf.mxu1 }
  0xfe   : > { %715 = vpow2.f32 %v610_v41  ;;  %v396_v45 = vadd.f32 %v586_v18, %v395_v43  ;;  %v412_v46 = vadd.f32 %v586_v18, %v411_v44 }
  0xff   : > { %717 = vpow2.f32 %v614_v42  ;;  %v397_v47 = vpop.f32.mrf.mxu0  ;;  %v413_v48 = vpop.f32.mrf.mxu1 }
 0x100   : > { %v611_v49 = vmul.f32 -1.442695, %v396_v45  ;;  %v615_v50 = vmul.f32 -1.442695, %v412_v46 }
 0x102   : > { %719 = vpow2.f32 %v611_v49 }
 0x103   : > { %v708_v51 = vpop.eup %707  ;;  %721 = vpow2.f32 %v615_v50 }
 0x104   : > { %v710_v52 = vpop.eup %709  ;;  %v439_v53 = vadd.f32 1.0, %v708_v51 }
 0x105   : > { %v443_v54 = vadd.f32 1.0, %v710_v52 }
 0x106   : > { %723 = vrcp.f32 %v439_v53 }
 0x107   : > { %v712_v55 = vpop.eup %711  ;;  %725 = vrcp.f32 %v443_v54 }
 0x108   : > { %v714_v56 = vpop.eup %713  ;;  %v440_v57 = vadd.f32 1.0, %v712_v55 }
 0x109   : > { %v444_v58 = vadd.f32 1.0, %v714_v56 }
 0x10a   : > { %727 = vrcp.f32 %v440_v57 }
 0x10b   : > { %v716_v59 = vpop.eup %715  ;;  %729 = vrcp.f32 %v444_v58 }
 0x10c   : > { %v718_v60 = vpop.eup %717  ;;  %v441_v61 = vadd.f32 1.0, %v716_v59 }
 0x10d   : > { %v445_v62 = vadd.f32 1.0, %v718_v60 }
 0x10e   : > { %731 = vrcp.f32 %v441_v61 }
 0x10f   : > { %v720_v63 = vpop.eup %719  ;;  %733 = vrcp.f32 %v445_v62 }
 0x110   : > { %v722_v0 = vpop.eup %721  ;;  %v442_v1 = vadd.f32 1.0, %v720_v63 }
 0x111   : > { %v446_v2 = vadd.f32 1.0, %v722_v0 }
 0x112   : > { %735 = vrcp.f32 %v442_v1 }
 0x113   : > { %737 = vrcp.f32 %v446_v2  ;;  %v724_v3 = vpop.eup %723 }
 0x114   : > { %v726_v4 = vpop.eup %725  ;;  %v463_v7 = vmul.f32 %v724_v3, %v852_v21 }
 0x115   : > { %v467_v9 = vmul.f32 %v726_v4, %v854_v22 }
 0x117   : > { %v728_v5 = vpop.eup %727 }
 0x118   : > { %v730_v6 = vpop.eup %729  ;;  %v464_v8 = vmul.f32 %v728_v5, %v388_v29 }
 0x119   : > { %v468_v10 = vmul.f32 %v730_v6, %v404_v30 }
 0x11a   : > { %v623_v11 = vpack.c.bf16 %v464_v8, %v463_v7 }
 0x11b   : > { %v633_v12 = vpack.c.bf16 %v468_v10, %v467_v9  ;;  %v732_v13 = vpop.eup %731 }
 0x11c   : > { %624 = vst [vmem:[%s211_s20] sm:$0xff] %v623_v11   ;;  %v734_v14 = vpop.eup %733  ;;  %v465_v17 = vmul.f32 %v732_v13, %v393_v37 }
 0x11d   : > { %641 = vst [vmem:[%s211_s20 + $0x10] sm:$0xff] %v633_v12   ;;  %v469_v19 = vmul.f32 %v734_v14, %v409_v38 }
 0x11f   : > { %v736_v15 = vpop.eup %735 }
 0x120   : > { %v738_v16 = vpop.eup %737  ;;  %v466_v18 = vmul.f32 %v736_v15, %v396_v45 }
 0x121   : > { %v470_v20 = vmul.f32 %v738_v16, %v412_v46 }
 0x122   : > { %v628_v21 = vpack.c.bf16 %v466_v18, %v465_v17 }
 0x123   : > { %v638_v23 = vpack.c.bf16 %v470_v20, %v469_v19 }
 0x124   : > { %640 = vst [vmem:[%s211_s20 + $0x8] sm:$0xff] %v628_v21  }
 0x125   : > { %642 = vst [vmem:[%s211_s20 + $0x18] sm:$0xff] %v638_v23  }
 0x126 PF: > { %s13_s14 = sadd.s32 1, %s761_s14   ;;  %s877_s12 = smov %s757_s13 }
 0x127   : > { %p10_p5 = scmp.ge.s32.totalorder %s13_s14, 4   ;;  %s878_s13 = smov %s880_s15 }
 0x129   :  { %12 = sbr.rel (!%p10_p5) target bundleno = 2 (0x2), region = 62 }

</bundles_post_ra>
